<compile_context>
chip_gen: v7x
topology: tpu7x:2x2x1
jax: 0.10.0
libtpu: 0.0.40
codegen_flags: <defaults>
</compile_context>

<pallas_src>
import functools

import jax
import jax.numpy as jnp
from jax.experimental import pallas as pl
from jax.experimental.pallas import tpu as pltpu


def _round_up(x, m):
    return (x + m - 1) // m * m


def _pick_row_tile(ho, wo):
    """Smallest divisor of `ho` whose useful output lanes (th*wo) fill a vreg row."""
    for th in range(1, ho + 1):
        if ho % th == 0 and th * wo >= 128:
            return th
    return ho


def _sepconv_kernel(band_ref, w_ref, o_ref, *, kh_dim, kw_dim, stride, wp):
    # band_ref: (1, 1, Cin, L_band)  flattened input band (row pitch = wp) for this
    #                                (batch, row-tile) grid step.
    # w_ref   : (KH*KW, Cout, Cin)   folded depthwise*pointwise weights.
    # o_ref   : (1, Cout, L_acc)     wide NCHW-flat output tile (row pitch wp,
    #                                L_acc a multiple of 128 -> lane-dense stores).
    cout, l_acc = o_ref.shape[1], o_ref.shape[2]

    acc = jnp.zeros((cout, l_acc), jnp.float32)
    # KH*KW accumulating MXU matmuls; all slab reads are static ref slices
    # (no materialized-value slicing, no in-kernel reshape).
    for ih in range(kh_dim):
        for iw in range(kw_dim):
            start = ih * wp + iw
            if stride == 1:
                slab = band_ref[0, 0, :, pl.ds(start, l_acc)]            # (Cin, L_acc)
            else:
                slab = band_ref[0, 0, :, pl.ds(start, l_acc, stride)]    # strided lanes
            w_tap = w_ref[ih * kw_dim + iw]                              # (Cout, Cin)
            acc = acc + jnp.dot(w_tap, slab, preferred_element_type=jnp.float32)
    o_ref[0] = acc.astype(o_ref.dtype)


def separable_conv2d(x, dw_weight, pw_weight, *, stride=1, padding=0):
    """x: (N, Cin, H, W); dw_weight: (Cin, 1, KH, KW); pw_weight: (Cout, Cin, 1, 1).
    Returns (N, Cout, Ho, Wo) -- same semantics as depthwise(conv)->pointwise(conv),
    bias=False."""
    n, cin, h, w = x.shape
    kh, kw = int(dw_weight.shape[2]), int(dw_weight.shape[3])
    cout = int(pw_weight.shape[0])

    hp = h + 2 * padding
    wp = w + 2 * padding
    ho = (hp - kh) // stride + 1
    wo = (wp - kw) // stride + 1

    th = _pick_row_tile(ho, wo)                      # output rows per grid step
    nrt = ho // th                                   # number of row tiles
    l_acc = _round_up(th * wp, 128)                  # wide output lanes per tile
    l_band = (kh - 1) * wp + (kw - 1) + (l_acc - 1) * stride + 1   # input lanes/tile

    # ---- fold depthwise into pointwise: W_eff[tap, co, ci] = Wp[co,ci] * Wd[ci,kh,kw]
    wd = jnp.transpose(dw_weight[:, 0, :, :], (1, 2, 0)).reshape(kh * kw, 1, cin)
    wpm = pw_weight[:, :, 0, 0][None]                # (1, Cout, Cin)
    w_eff = (wd.astype(jnp.float32) * wpm.astype(jnp.float32)).astype(x.dtype)

    # ---- spatial zero-padding + overlapping (halo) row bands, flattened (pitch = wp)
    rows_needed = (nrt - 1) * th * stride + pl.cdiv(l_band, wp)
    hp_ext = max(hp, rows_needed)                    # extra bottom rows only feed the
    x_pad = jnp.pad(                                 # garbage lanes that get sliced off
        x, ((0, 0), (0, 0), (padding, padding + (hp_ext - hp)), (padding, padding)))
    x_flat = x_pad.reshape(n, cin, hp_ext * wp)
    bands = jnp.stack(
        [jax.lax.slice_in_dim(x_flat, r * th * stride * wp,
                              r * th * stride * wp + l_band, axis=2)
         for r in range(nrt)],
        axis=1)                                      # (N, NRT, Cin, L_band)

    kernel = functools.partial(_sepconv_kernel, kh_dim=kh, kw_dim=kw,
                               stride=stride, wp=wp)

    out_wide = pl.pallas_call(
        kernel,
        out_shape=jax.ShapeDtypeStruct((n, cout, nrt * l_acc), x.dtype),
        grid_spec=pltpu.PrefetchScalarGridSpec(
            num_scalar_prefetch=0,
            grid=(n, nrt),                           # batch x row-tiles: >2 pipeline steps
            in_specs=[
                # per-step input band; last two dims equal the full array dims
                pl.BlockSpec((1, 1, cin, l_band), lambda b, r: (b, r, 0, 0)),
                # folded weights: resident across all steps
                pl.BlockSpec((kh * kw, cout, cin), lambda b, r: (0, 0, 0)),
            ],
            # (Cout, L_acc) block: (8,128)-aligned -> unmasked lane-dense stores
            out_specs=pl.BlockSpec((1, cout, l_acc), lambda b, r: (b, 0, r)),
        ),
        compiler_params=pltpu.CompilerParams(
            dimension_semantics=("parallel", "parallel"),
            vmem_limit_bytes=32 * 1024 * 1024,
        ),
    )(bands, w_eff)

    # wide (row pitch wp) -> dense NCHW: pure reshape + slice, no transpose.
    out = out_wide.reshape(n, cout, nrt, l_acc)[:, :, :, :th * wp]
    out = out.reshape(n, cout, nrt, th, wp)[:, :, :, :, :wo]
    return out.reshape(n, cout, ho, wo)


def _reference(x_nchw, dw_weight, pw_weight, *, stride, padding):
    cin = x_nchw.shape[1]
    dw = jax.lax.conv_general_dilated(
        x_nchw, dw_weight, window_strides=(stride, stride),
        padding=[(padding, padding), (padding, padding)],
        dimension_numbers=("NCHW", "OIHW", "NCHW"),
        feature_group_count=cin)
    return jax.lax.conv_general_dilated(
        dw, pw_weight, window_strides=(1, 1), padding=[(0, 0), (0, 0)],
        dimension_numbers=("NCHW", "OIHW", "NCHW"))


if __name__ == "__main__":
    # Module config: in_features=4, out_features=8, kernel_size=3, stride=1,
    # padding=1, bias=False.
    N, CIN, H, W = 2, 4, 16, 16
    COUT, K, STRIDE, PAD = 8, 3, 1, 1

    key = jax.random.PRNGKey(0)
    kx, kd, kp = jax.random.split(key, 3)
    x = jax.random.normal(kx, (N, CIN, H, W), dtype=jnp.float32)
    dw_weight = jax.random.normal(kd, (CIN, 1, K, K), dtype=jnp.float32) * 0.1
    pw_weight = jax.random.normal(kp, (COUT, CIN, 1, 1), dtype=jnp.float32) * 0.1

    out = separable_conv2d(x, dw_weight, pw_weight, stride=STRIDE, padding=PAD)
    out = jax.block_until_ready(out)

    ref = _reference(x, dw_weight, pw_weight, stride=STRIDE, padding=PAD)
    assert out.shape == (N, COUT, H, W), out.shape
    max_err = float(jnp.max(jnp.abs(out - ref)))
    assert jnp.allclose(out, ref, atol=1e-4, rtol=1e-4), max_err

    print("KERNEL_OK")
</pallas_src>

<mosaic_0001>
module attributes {stable_mosaic.version = 11 : i64} {
  func.func @_sepconv_kernel(%arg0: i32, %arg1: i32, %arg2: memref<1x1x4x294xf32, #tpu.memory_space<vmem>>, %arg3: memref<9x8x4xf32, #tpu.memory_space<vmem>>, %arg4: memref<1x8x256xf32, #tpu.memory_space<vmem>>) attributes {dimension_semantics = [#tpu.dimension_semantics<parallel>, #tpu.dimension_semantics<parallel>], iteration_bounds = array<i64: 2, 2>, scalar_prefetch = 0 : i64, scratch_operands = 0 : i64, tpu.core_type = #tpu.core_type<tc>, window_params = [{transform_indices = @transform_0, window_bounds = array<i64: 1, 1, 4, 294>}, {pipeline_mode = #tpu.pipeline_mode<synchronous>, transform_indices = @transform_1, window_bounds = array<i64: 9, 8, 4>}, {transform_indices = @transform_2, window_bounds = array<i64: 1, 8, 256>}]} {
    %cst = arith.constant 0.000000e+00 : f32
    %0 = vector.broadcast %cst : f32 to vector<8x256xf32>
    %c0 = arith.constant 0 : index
    %c0_0 = arith.constant 0 : index
    %c0_1 = arith.constant 0 : index
    %c0_2 = arith.constant 0 : index
    %1 = vector.load %arg2[%c0, %c0_0, %c0_1, %c0_2] : memref<1x1x4x294xf32, #tpu.memory_space<vmem>>, vector<1x1x4x256xf32>
    %2 = vector.shape_cast %1 : vector<1x1x4x256xf32> to vector<4x256xf32>
    %c0_3 = arith.constant 0 : index
    %c0_4 = arith.constant 0 : index
    %c0_5 = arith.constant 0 : index
    %3 = vector.load %arg3[%c0_3, %c0_4, %c0_5] : memref<9x8x4xf32, #tpu.memory_space<vmem>>, vector<1x8x4xf32>
    %4 = vector.shape_cast %3 : vector<1x8x4xf32> to vector<8x4xf32>
    %cst_6 = arith.constant dense<0.000000e+00> : vector<8x256xf32>
    %5 = tpu.matmul %4, %2, %cst_6 {dimension_numbers = #tpu.dot_dimension_numbers<[1], [0], [0], [1], [0, 0, 1, 1], [], []>} : vector<8x4xf32>, vector<4x256xf32>, vector<8x256xf32> -> vector<8x256xf32>
    %6 = arith.addf %0, %5 : vector<8x256xf32>
    %c0_7 = arith.constant 0 : index
    %c0_8 = arith.constant 0 : index
    %c0_9 = arith.constant 0 : index
    %c1 = arith.constant 1 : index
    %7 = vector.load %arg2[%c0_7, %c0_8, %c0_9, %c1] : memref<1x1x4x294xf32, #tpu.memory_space<vmem>>, vector<1x1x4x256xf32>
    %8 = vector.shape_cast %7 : vector<1x1x4x256xf32> to vector<4x256xf32>
    %c1_10 = arith.constant 1 : index
    %c0_11 = arith.constant 0 : index
    %c0_12 = arith.constant 0 : index
    %9 = vector.load %arg3[%c1_10, %c0_11, %c0_12] : memref<9x8x4xf32, #tpu.memory_space<vmem>>, vector<1x8x4xf32>
    %10 = vector.shape_cast %9 : vector<1x8x4xf32> to vector<8x4xf32>
    %cst_13 = arith.constant dense<0.000000e+00> : vector<8x256xf32>
    %11 = tpu.matmul %10, %8, %cst_13 {dimension_numbers = #tpu.dot_dimension_numbers<[1], [0], [0], [1], [0, 0, 1, 1], [], []>} : vector<8x4xf32>, vector<4x256xf32>, vector<8x256xf32> -> vector<8x256xf32>
    %12 = arith.addf %6, %11 : vector<8x256xf32>
    %c0_14 = arith.constant 0 : index
    %c0_15 = arith.constant 0 : index
    %c0_16 = arith.constant 0 : index
    %c2 = arith.constant 2 : index
    %13 = vector.load %arg2[%c0_14, %c0_15, %c0_16, %c2] : memref<1x1x4x294xf32, #tpu.memory_space<vmem>>, vector<1x1x4x256xf32>
    %14 = vector.shape_cast %13 : vector<1x1x4x256xf32> to vector<4x256xf32>
    %c2_17 = arith.constant 2 : index
    %c0_18 = arith.constant 0 : index
    %c0_19 = arith.constant 0 : index
    %15 = vector.load %arg3[%c2_17, %c0_18, %c0_19] : memref<9x8x4xf32, #tpu.memory_space<vmem>>, vector<1x8x4xf32>
    %16 = vector.shape_cast %15 : vector<1x8x4xf32> to vector<8x4xf32>
    %cst_20 = arith.constant dense<0.000000e+00> : vector<8x256xf32>
    %17 = tpu.matmul %16, %14, %cst_20 {dimension_numbers = #tpu.dot_dimension_numbers<[1], [0], [0], [1], [0, 0, 1, 1], [], []>} : vector<8x4xf32>, vector<4x256xf32>, vector<8x256xf32> -> vector<8x256xf32>
    %18 = arith.addf %12, %17 : vector<8x256xf32>
    %c0_21 = arith.constant 0 : index
    %c0_22 = arith.constant 0 : index
    %c0_23 = arith.constant 0 : index
    %c18 = arith.constant 18 : index
    %19 = vector.load %arg2[%c0_21, %c0_22, %c0_23, %c18] : memref<1x1x4x294xf32, #tpu.memory_space<vmem>>, vector<1x1x4x256xf32>
    %20 = vector.shape_cast %19 : vector<1x1x4x256xf32> to vector<4x256xf32>
    %c3 = arith.constant 3 : index
    %c0_24 = arith.constant 0 : index
    %c0_25 = arith.constant 0 : index
    %21 = vector.load %arg3[%c3, %c0_24, %c0_25] : memref<9x8x4xf32, #tpu.memory_space<vmem>>, vector<1x8x4xf32>
    %22 = vector.shape_cast %21 : vector<1x8x4xf32> to vector<8x4xf32>
    %cst_26 = arith.constant dense<0.000000e+00> : vector<8x256xf32>
    %23 = tpu.matmul %22, %20, %cst_26 {dimension_numbers = #tpu.dot_dimension_numbers<[1], [0], [0], [1], [0, 0, 1, 1], [], []>} : vector<8x4xf32>, vector<4x256xf32>, vector<8x256xf32> -> vector<8x256xf32>
    %24 = arith.addf %18, %23 : vector<8x256xf32>
    %c0_27 = arith.constant 0 : index
    %c0_28 = arith.constant 0 : index
    %c0_29 = arith.constant 0 : index
    %c19 = arith.constant 19 : index
    %25 = vector.load %arg2[%c0_27, %c0_28, %c0_29, %c19] : memref<1x1x4x294xf32, #tpu.memory_space<vmem>>, vector<1x1x4x256xf32>
    %26 = vector.shape_cast %25 : vector<1x1x4x256xf32> to vector<4x256xf32>
    %c4 = arith.constant 4 : index
    %c0_30 = arith.constant 0 : index
    %c0_31 = arith.constant 0 : index
    %27 = vector.load %arg3[%c4, %c0_30, %c0_31] : memref<9x8x4xf32, #tpu.memory_space<vmem>>, vector<1x8x4xf32>
    %28 = vector.shape_cast %27 : vector<1x8x4xf32> to vector<8x4xf32>
    %cst_32 = arith.constant dense<0.000000e+00> : vector<8x256xf32>
    %29 = tpu.matmul %28, %26, %cst_32 {dimension_numbers = #tpu.dot_dimension_numbers<[1], [0], [0], [1], [0, 0, 1, 1], [], []>} : vector<8x4xf32>, vector<4x256xf32>, vector<8x256xf32> -> vector<8x256xf32>
    %30 = arith.addf %24, %29 : vector<8x256xf32>
    %c0_33 = arith.constant 0 : index
    %c0_34 = arith.constant 0 : index
    %c0_35 = arith.constant 0 : index
    %c20 = arith.constant 20 : index
    %31 = vector.load %arg2[%c0_33, %c0_34, %c0_35, %c20] : memref<1x1x4x294xf32, #tpu.memory_space<vmem>>, vector<1x1x4x256xf32>
    %32 = vector.shape_cast %31 : vector<1x1x4x256xf32> to vector<4x256xf32>
    %c5 = arith.constant 5 : index
    %c0_36 = arith.constant 0 : index
    %c0_37 = arith.constant 0 : index
    %33 = vector.load %arg3[%c5, %c0_36, %c0_37] : memref<9x8x4xf32, #tpu.memory_space<vmem>>, vector<1x8x4xf32>
    %34 = vector.shape_cast %33 : vector<1x8x4xf32> to vector<8x4xf32>
    %cst_38 = arith.constant dense<0.000000e+00> : vector<8x256xf32>
    %35 = tpu.matmul %34, %32, %cst_38 {dimension_numbers = #tpu.dot_dimension_numbers<[1], [0], [0], [1], [0, 0, 1, 1], [], []>} : vector<8x4xf32>, vector<4x256xf32>, vector<8x256xf32> -> vector<8x256xf32>
    %36 = arith.addf %30, %35 : vector<8x256xf32>
    %c0_39 = arith.constant 0 : index
    %c0_40 = arith.constant 0 : index
    %c0_41 = arith.constant 0 : index
    %c36 = arith.constant 36 : index
    %37 = vector.load %arg2[%c0_39, %c0_40, %c0_41, %c36] : memref<1x1x4x294xf32, #tpu.memory_space<vmem>>, vector<1x1x4x256xf32>
    %38 = vector.shape_cast %37 : vector<1x1x4x256xf32> to vector<4x256xf32>
    %c6 = arith.constant 6 : index
    %c0_42 = arith.constant 0 : index
    %c0_43 = arith.constant 0 : index
    %39 = vector.load %arg3[%c6, %c0_42, %c0_43] : memref<9x8x4xf32, #tpu.memory_space<vmem>>, vector<1x8x4xf32>
    %40 = vector.shape_cast %39 : vector<1x8x4xf32> to vector<8x4xf32>
    %cst_44 = arith.constant dense<0.000000e+00> : vector<8x256xf32>
    %41 = tpu.matmul %40, %38, %cst_44 {dimension_numbers = #tpu.dot_dimension_numbers<[1], [0], [0], [1], [0, 0, 1, 1], [], []>} : vector<8x4xf32>, vector<4x256xf32>, vector<8x256xf32> -> vector<8x256xf32>
    %42 = arith.addf %36, %41 : vector<8x256xf32>
    %c0_45 = arith.constant 0 : index
    %c0_46 = arith.constant 0 : index
    %c0_47 = arith.constant 0 : index
    %c37 = arith.constant 37 : index
    %43 = vector.load %arg2[%c0_45, %c0_46, %c0_47, %c37] : memref<1x1x4x294xf32, #tpu.memory_space<vmem>>, vector<1x1x4x256xf32>
    %44 = vector.shape_cast %43 : vector<1x1x4x256xf32> to vector<4x256xf32>
    %c7 = arith.constant 7 : index
    %c0_48 = arith.constant 0 : index
    %c0_49 = arith.constant 0 : index
    %45 = vector.load %arg3[%c7, %c0_48, %c0_49] : memref<9x8x4xf32, #tpu.memory_space<vmem>>, vector<1x8x4xf32>
    %46 = vector.shape_cast %45 : vector<1x8x4xf32> to vector<8x4xf32>
    %cst_50 = arith.constant dense<0.000000e+00> : vector<8x256xf32>
    %47 = tpu.matmul %46, %44, %cst_50 {dimension_numbers = #tpu.dot_dimension_numbers<[1], [0], [0], [1], [0, 0, 1, 1], [], []>} : vector<8x4xf32>, vector<4x256xf32>, vector<8x256xf32> -> vector<8x256xf32>
    %48 = arith.addf %42, %47 : vector<8x256xf32>
    %c0_51 = arith.constant 0 : index
    %c0_52 = arith.constant 0 : index
    %c0_53 = arith.constant 0 : index
    %c38 = arith.constant 38 : index
    %49 = vector.load %arg2[%c0_51, %c0_52, %c0_53, %c38] : memref<1x1x4x294xf32, #tpu.memory_space<vmem>>, vector<1x1x4x256xf32>
    %50 = vector.shape_cast %49 : vector<1x1x4x256xf32> to vector<4x256xf32>
    %c8 = arith.constant 8 : index
    %c0_54 = arith.constant 0 : index
    %c0_55 = arith.constant 0 : index
    %51 = vector.load %arg3[%c8, %c0_54, %c0_55] : memref<9x8x4xf32, #tpu.memory_space<vmem>>, vector<1x8x4xf32>
    %52 = vector.shape_cast %51 : vector<1x8x4xf32> to vector<8x4xf32>
    %cst_56 = arith.constant dense<0.000000e+00> : vector<8x256xf32>
    %53 = tpu.matmul %52, %50, %cst_56 {dimension_numbers = #tpu.dot_dimension_numbers<[1], [0], [0], [1], [0, 0, 1, 1], [], []>} : vector<8x4xf32>, vector<4x256xf32>, vector<8x256xf32> -> vector<8x256xf32>
    %54 = arith.addf %48, %53 : vector<8x256xf32>
    %c0_57 = arith.constant 0 : index
    %c0_58 = arith.constant 0 : index
    %c0_59 = arith.constant 0 : index
    %55 = vector.load %arg4[%c0_57, %c0_58, %c0_59] : memref<1x8x256xf32, #tpu.memory_space<vmem>>, vector<1x8x256xf32>
    %56 = vector.shape_cast %55 : vector<1x8x256xf32> to vector<8x256xf32>
    %57 = vector.shape_cast %54 : vector<8x256xf32> to vector<1x8x256xf32>
    tpu.vector_store %arg4[%c0_57, %c0_58, %c0_59], %57 {strides = array<i32>} : memref<1x8x256xf32, #tpu.memory_space<vmem>>, vector<1x8x256xf32>,
    return
  }
  func.func @transform_0(%arg0: i32, %arg1: i32) -> (i32, i32, i32, i32) {
    %c0_i32 = arith.constant 0 : i32
    %c0_i32_0 = arith.constant 0 : i32
    %c0_i32_1 = arith.constant 0 : i32
    return %arg0, %arg1, %c0_i32, %c0_i32_0 : i32, i32, i32, i32
  }
  func.func @transform_1(%arg0: i32, %arg1: i32) -> (i32, i32, i32) {
    %c0_i32 = arith.constant 0 : i32
    %c0_i32_0 = arith.constant 0 : i32
    %c0_i32_1 = arith.constant 0 : i32
    %c0_i32_2 = arith.constant 0 : i32
    return %c0_i32, %c0_i32_0, %c0_i32_1 : i32, i32, i32
  }
  func.func @transform_2(%arg0: i32, %arg1: i32) -> (i32, i32, i32) {
    %c0_i32 = arith.constant 0 : i32
    %c0_i32_0 = arith.constant 0 : i32
    return %arg0, %c0_i32, %arg1 : i32, i32, i32
  }
}

</mosaic_0001>

<bundles_post_ra>
// kernel: tpu_custom_call.1
= control target key start
LH: loop header
LB: loop body
LE: loop exit
PB: predicated region body
PF: predicated region fallthrough
CT: control target
= control target key end

     0   :  { %7 = vsyncpa [#allocation3], 0  ;;  %s1626_s0 = inlined_call_operand.vmem [shape: f32[2,2,4,294], index: 0, kind: input, shape index: {}]   ;;  %s1627_s1 = inlined_call_operand.vmem [shape: f32[9,8,4], index: 1, kind: input, shape index: {}]   ;;  %s1628_s2 = inlined_call_operand.hbm [shape: f32[2,8,512], index: 2, kind: output, shape index: {}]  }
   0x1   :  { %9 = vsyncpa [#allocation3 + $0x1], 0  ;;  %s1387_s9 = smov 0   ;;  %s1389_s10 = smov 0  }
   0x2   :  { %s1391_s11 = smov 0   ;;  %s1393_s12 = smov 0  }
   0x3   :  { %s1395_s13 = smov 0   ;;  %s1397_s14 = smov 0  }
   0x4   :  { %s1399_s15 = smov 0   ;;  %s1401_s16 = smov 0  }
   0x5 LB: > { %s1119_s17 = sadd.s32 4294967295, %s1360_s16   ;;  %s1120_s18 = sadd.s32 4294967294, %s1360_s16   ;;  %s1360_s16 = sphi %s1401_s16, %s15_s16   ;;  %s1356_s15 = sphi %s1399_s15, %s1637_s15   ;;  %s1352_s14 = sphi %s1397_s14, %s1636_s14   ;;  %s1348_s13 = sphi %s1395_s13, %s1635_s13   ;;  %s1344_s12 = sphi %s1393_s12, %s1634_s12   ;;  %s1340_s11 = sphi %s1391_s11, %s1633_s11   ;;  %s1336_s10 = sphi %s1389_s10, %s1632_s10   ;;  %s1332_s9 = sphi %s1387_s9, %s1631_s9  }
   0x6   : > { %s24_s19 = sadd.s32 1, %s1352_s14  ;;  %s27_s20 = sadd.s32 1, %s1356_s15 }
   0x7   : > { %p25_p0 = scmp.ge.s32.totalorder %s24_s19, 2  ;;  %p95_p1 = scmp.ne.s32.totalorder %s1340_s11, %s1336_s10 }
   0x8   : > { %p96_p2 = scmp.eq.s32.totalorder %s1119_s17, 3  ;;  %p101_p5 = scmp.ne.s32.totalorder %s1336_s10, %s1332_s9 }
   0x9   : > { %s1639_s19 = smov (%p25_p0, %s24_s19), 0  ;;  %s1641_s20 = smov (!%p25_p0, %s27_s20), %s1356_s15 }
   0xa   : > { %s81_s21 = ssub.s32 %s1352_s14, %s1639_s19  ;;  %p1438_p3 = por %p96_p2, %p95_p1 }
   0xb   : > { %p29_p4 = scmp.ge.s32.totalorder %s1641_s20, 2  ;;  %p102_p6 = scmp.eq.s32.totalorder %s1120_s18, 3 }
   0xc   : > { %p1123_p7 = scmp.ge.s32.totalorder %s1360_s16, 1  ;;  %p135_p9 = scmp.lt.s32.totalorder %s1360_s16, 5 }
   0xd   : > { %s1643_s20 = smov (%p29_p4, %s1641_s20), 0  ;;  %p1447_p8 = por %p102_p6, %p101_p5 }
   0xe   : > { %s80_s24 = ssub.s32 %s1356_s15, %s1643_s20  ;;  %s85_s25 = sadd.s32 1, %s1340_s11 }
   0xf   : > { %s82_s26 = sor.u32 %s81_s21, %s80_s24  ;;  %p136_p10 = pnand %p1123_p7, %p135_p9 }
  0x10   : > { %p83_p11 = scmp.eq.s32.totalorder %s82_s26, 0  ;;  %p161_p12 = scmp.lt.s32.totalorder (!%p136_p10), %s1348_s13, 1  ;;  %v1363_v3 = vmov (!%p136_p10), 0.0   ;;  %vm185_vm0 = vcmask (!%p136_p10), 1039360   ;;  %vm551_vm1 = vcmask (!%p136_p10), 891904   ;;  %vm192_vm2 = vcmask (!%p136_p10), 1043456  }
  0x11   : > { %139 = sbr.rel (%p136_p10) target bundleno = 423 (0x1a7), region = 28  ;;  %p163_p13 = scmp.lt.s32.totalorder (!%p136_p10), %s1344_s12, 1  ;;  %625 = vmatprep.mubr.f32.mxu0 (!%p136_p10), %v1363_v3  ;;  %261 = vmatprep.mubr.f32.mxu1 (!%p136_p10), %v1363_v3  ;;  %vm188_vm3 = vcmask (!%p136_p10), 31744   ;;  %v1141_v21 = vld [vmem:[%s1627_s1 + $0x20] sm:$0xff] (!%p136_p10)  ;;  %v1126_v22 = vld [vmem:[%s1627_s1 + $0x8] sm:$0xff] (!%p136_p10)  ;;  %vm647_vm4 = vcmask (!%p136_p10), 883712  }
  0x12   : > { %s1456_s27 = scalar_select %p83_p11, %s1340_s11, %s85_s25  }
  0x13   : > { %s1362_s17 = smov (!%p136_p10), 109   ;;  %s1364_s18 = smov (!%p136_p10), 127   ;;  %v1145_v29 = vld [vmem:[%s1627_s1 + $0x28] sm:$0xff] (!%p136_p10)  ;;  %v172_v30 = vld [vmem:[%s1627_s1] sm:$0xff] (!%p136_p10)  ;;  %vm743_vm5 = vcmask (!%p136_p10), 752640   ;;  %vm359_vm6 = vcmask (!%p136_p10), 1031168  }
  0x14   : > { %s1365_s21 = smov (!%p136_p10), 108   ;;  %s1366_s24 = smov (!%p136_p10), 92   ;;  %v1149_v38 = vld [vmem:[%s1627_s1 + $0x30] sm:$0xff] (!%p136_p10)  ;;  %vm839_vm7 = vcmask (!%p136_p10), 744448   ;;  %v1153_v47 = vld [vmem:[%s1627_s1 + $0x38] sm:$0xff] (!%p136_p10)  ;;  %vm455_vm8 = vcmask (!%p136_p10), 900096  }
  0x15   : > { %s1367_s25 = smov (!%p136_p10), 126   ;;  %s1368_s26 = smov (!%p136_p10), 91   ;;  %v1133_v44 = vld [vmem:[%s1627_s1 + $0x10] sm:$0xff] (!%p136_p10)  ;;  %vm935_vm9 = vcmask (!%p136_p10), 736256   ;;  %v1137_v56 = vld [vmem:[%s1627_s1 + $0x18] sm:$0xff] (!%p136_p10)  ;;  %v1157_v57 = vld [vmem:[%s1627_s1 + $0x40] sm:$0xff] (!%p136_p10) }
  0x16   : > { %s1162_s7 = sshll.u32 (!%p136_p10), %s1344_s12, 1 }
  0x18   : > { %s162_s28 = scalar_select %p161_p12, %s1348_s13, 1 }
  0x19   : > { %s164_s29 = scalar_select %p163_p13, %s1344_s12, 1 }
  0x1a   : > { %s1184_s30 = smul.u32 6, %s162_s28  ;;  %s1369_s28 = smov 110  }
  0x1b   : > { %s1183_s3 = smul.u32 3, %s164_s29  ;;  %s1370_s29 = smov 90  }
  0x1d   : > { %s167_s4 = sadd.s32 %s1184_s30, %s1183_s3 }
  0x1e   : > { %s1125_s5 = sshll.u32 %s167_s4, 2 }
  0x1f   : > { %s1465_s8 = scalar_lea.vmem %s1626_s0, %s1125_s5  ;;  %s158_s5 = sand.u32 1, %s1336_s10  }
  0x20   : > { %v539_v0 = vld [vmem:[%s1465_s8 + $0x8] sm:$0xf]  ;;  %v1469_v1 = vld [vmem:[%s1465_s8] sm:$0xff]  ;;  %s1124_s6 = sshll.u32 %s158_s5, 4  ;;  %s1021_s12 = scalar_lea.sflag [#allocation3], %s158_s5 }
  0x21   : > { %549 = vrot.lane.b32.xlu0 %v539_v0, %s1362_s17  ;;  %545 = vrot.lane.b32.xlu1 %v1469_v1, %s1362_s17  ;;  %v173_v2 = vld [vmem:[%s1465_s8 + $0x8] sm:$0xf]  ;;  %v1477_v4 = vcombine.high %v1469_v1, %v1469_v1 }
  0x22   : > { %v635_v5 = vld [vmem:[%s1465_s8 + $0x8] sm:$0xf] }
  0x23   : > { %v731_v6 = vld [vmem:[%s1465_s8 + $0x8] sm:$0xf] }
  0x24   : > { %v347_v7 = vld [vmem:[%s1465_s8 + $0x8] sm:$0xf] }
  0x25   : > { %183 = vrot.lane.b32.xlu0 %v173_v2, %s1364_s18  ;;  %179 = vrot.lane.b32.xlu1 %v1469_v1, %s1364_s18  ;;  %v827_v8 = vld [vmem:[%s1465_s8 + $0x8] sm:$0xf] }
  0x26   : > { %v443_v9 = vld [vmem:[%s1465_s8 + $0x8] sm:$0xf] }
  0x27   : > { %v923_v10 = vld [vmem:[%s1465_s8 + $0x8] sm:$0xf]  ;;  %s1163_s8 = sshll.u32 %s1348_s13, 2 }
  0x29   : > { %547 = vrot.lane.b32.xlu0 %v1477_v4, %s1362_s17  ;;  %181 = vrot.lane.b32.xlu1 %v1477_v4, %s1364_s18  ;;  %s1033_s17 = sadd.s32 %s1163_s8, %s1162_s7 }
  0x2a   : > { %s1164_s18 = sshll.u32 %s1033_s17, 7 }
  0x2d   : > { %645 = vrot.lane.b32.xlu0 %v635_v5, %s1365_s21  ;;  %643 = vrot.lane.b32.xlu1 %v1477_v4, %s1365_s21 }
  0x31   : > { %641 = vrot.lane.b32.xlu0 %v1469_v1, %s1365_s21  ;;  %739 = vrot.lane.b32.xlu1 %v1477_v4, %s1366_s24  ;;  %s160_s21 = scalar_lea.vmem [#allocation2], %s1124_s6 }
  0x35   : > { %741 = vrot.lane.b32.xlu0 %v731_v6, %s1366_s24  ;;  %737 = vrot.lane.b32.xlu1 %v1469_v1, %s1366_s24  ;;  %s1037_s24 = sshll.u32 %s160_s21, 4  ;;  %s1575_s24 = int_to_ptr.vmem [resolvable:$true] %s1037_s24 }
  0x36   : > { %s1266_s13 = scalar_lea.vmem %s1575_s24, 256 }
  0x37   : > { %p1267_p0 = scmp.ne.s32.totalorder %s1575_s24, %s1266_s13 }
  0x39   : > { %355 = vrot.lane.b32.xlu0 %v1477_v4, %s1367_s25  ;;  %357 = vrot.lane.b32.xlu1 %v347_v7, %s1367_s25  ;;  %p1268_p1 = pnand %p1267_p0, %p1438_p3 }
  0x3b   : > { %p1269_p2 = pneg %p1268_p1 }
  0x3d   : > { %835 = vrot.lane.b32.xlu0 %v1477_v4, %s1368_s26  ;;  %837 = vrot.lane.b32.xlu1 %v827_v8, %s1368_s26 }
  0x41   : > { %353 = vrot.lane.b32.xlu0 %v1469_v1, %s1367_s25  ;;  %833 = vrot.lane.b32.xlu1 %v1469_v1, %s1368_s26 }
  0x45   : > { %451 = vrot.lane.b32.xlu0 %v1477_v4, %s1369_s28  ;;  %453 = vrot.lane.b32.xlu1 %v443_v9, %s1369_s28 }
  0x49   : > { %931 = vrot.lane.b32.xlu0 %v1477_v4, %s1370_s29  ;;  %933 = vrot.lane.b32.xlu1 %v923_v10, %s1370_s29 }
  0x4d   : > { %449 = vrot.lane.b32.xlu0 %v1469_v1, %s1369_s28  ;;  %929 = vrot.lane.b32.xlu1 %v1469_v1, %s1370_s29  ;;  %s1573_s28 = scalar_lea.hbm %s1628_s2, %s1164_s18  ;;  %s1371_s29 = smov [#allocation2]  }
  0x4e   : > { %s1270_s30 = sshll.u32 %s1371_s29, 4  ;;  %s1271_s30 = int_to_ptr.vmem [resolvable:$false] %s1270_s30 }
  0x4f   : > { %s1272_s3 = scalar_lea.vmem %s1271_s30, 512  ;;  %p1273_p4 = scmp.lt.s32.totalorder %s1575_s24, %s1271_s30 }
  0x50   : > { %p1274_p5 = scmp.lt.s32.totalorder %s1272_s3, %s1266_s13 }
  0x52   : > { %p1275_p6 = por %p1274_p5, %p1273_p4 }
  0x54   : > { %p1276_p7 = pnand %p1275_p6, %p1269_p2 }
  0x93   : > { %v550_v11 = vpop.permute.xlu0 %549  ;;  %v546_v12 = vpop.permute.xlu1 %545 }
  0x97   : > { %v184_v13 = vpop.permute.xlu0 %183  ;;  %v180_v14 = vpop.permute.xlu1 %179 }
  0x9b   : > { %v548_v15 = vpop.permute.xlu0 %547  ;;  %v182_v16 = vpop.permute.xlu1 %181 }
  0x9c   : > { %v187_v17 = vsel %vm185_vm0, %v182_v16, %v184_v13  ;;  %v553_v18 = vsel %vm551_vm1, %v548_v15, %v550_v11  ;;  %v186_v19 = vsel %vm185_vm0, %v180_v14, %v182_v16  ;;  %v552_v20 = vsel %vm551_vm1, %v546_v12, %v548_v15 }
  0x9d   : > { %1127 = vmatprep.subr.msk.mxu1 %vm192_vm2, %v187_v17  ;;  %1142 = vmatprep.subr.msk.mxu0 %vm192_vm2, %v553_v18 }
  0x9e   : > { %1128 = vmatpush1.msk.msra.mxu1 %vm192_vm2, %v186_v19  ;;  %1143 = vmatpush1.msk.msra.mxu0 %vm192_vm2, %v552_v20 }
  0x9f   : > { %v646_v23 = vpop.permute.xlu0 %645  ;;  %v644_v24 = vpop.permute.xlu1 %643  ;;  %1144 = vmatmul.mubr.msk.f32.vlgmr.msra.gmra.mrb[0].mxu0 %vm188_vm3, %v1141_v21  ;;  %1129 = vmatmul.mubr.msk.f32.vlgmr.msra.gmra.mrb[0].mxu1 %vm188_vm3, %v1126_v22 }
  0xa0   : > { %v649_v25 = vsel %vm647_vm4, %v644_v24, %v646_v23  ;;  %721 = vmatprep.mubr.f32.mxu0 %v1363_v3  ;;  %1130 = vmatprep.subr.msk.mxu1 %vm192_vm2, %v1477_v4 }
  0xa1   : > { %1146 = vmatprep.subr.msk.mxu0 %vm192_vm2, %v649_v25  ;;  %1131 = vmatpush1.msk.msra.mxu1 %vm192_vm2, %v1469_v1 }
  0xa2   : > { %339 = vmatprep.mubr.f32.mxu1 %v1363_v3 }
  0xa3   : > { %v642_v26 = vpop.permute.xlu0 %641  ;;  %v740_v27 = vpop.permute.xlu1 %739 }
  0xa4   : > { %v648_v28 = vsel %vm647_vm4, %v642_v26, %v644_v24 }
  0xa5   : > { %1147 = vmatpush1.msk.msra.mxu0 %vm192_vm2, %v648_v28 }
  0xa7   : > { %v742_v31 = vpop.permute.xlu0 %741  ;;  %v738_v32 = vpop.permute.xlu1 %737  ;;  %1148 = vmatmul.mubr.msk.f32.vlgmr.msra.gmra.mrb[0].mxu0 %vm188_vm3, %v1145_v29  ;;  %1132 = vmatmul.mubr.msk.f32.vlgmr.msra.gmra.mrb[0].mxu1 %vm188_vm3, %v172_v30 }
  0xa8   : > { %v745_v33 = vsel %vm743_vm5, %v740_v27, %v742_v31  ;;  %v744_v34 = vsel %vm743_vm5, %v738_v32, %v740_v27  ;;  %817 = vmatprep.mubr.f32.mxu0 %v1363_v3  ;;  %433 = vmatprep.mubr.f32.mxu1 %v1363_v3 }
  0xa9   : > { %1150 = vmatprep.subr.msk.mxu0 %vm192_vm2, %v745_v33 }
  0xaa   : > { %1151 = vmatpush1.msk.msra.mxu0 %vm192_vm2, %v744_v34 }
  0xab   : > { %v356_v35 = vpop.permute.xlu0 %355  ;;  %v358_v36 = vpop.permute.xlu1 %357 }
  0xac   : > { %v361_v37 = vsel %vm359_vm6, %v356_v35, %v358_v36 }
  0xad   : > { %1134 = vmatprep.subr.msk.mxu1 %vm192_vm2, %v361_v37 }
  0xaf   : > { %v836_v39 = vpop.permute.xlu0 %835  ;;  %v838_v40 = vpop.permute.xlu1 %837  ;;  %1152 = vmatmul.mubr.msk.f32.vlgmr.msra.gmra.mrb[0].mxu0 %vm188_vm3, %v1149_v38 }
  0xb0   : > { %v841_v41 = vsel %vm839_vm7, %v836_v39, %v838_v40  ;;  %913 = vmatprep.mubr.f32.mxu0 %v1363_v3 }
  0xb1   : > { %1154 = vmatprep.subr.msk.mxu0 %vm192_vm2, %v841_v41 }
  0xb3   : > { %v354_v42 = vpop.permute.xlu0 %353  ;;  %v834_v43 = vpop.permute.xlu1 %833 }
  0xb4   : > { %v360_v45 = vsel %vm359_vm6, %v354_v42, %v356_v35  ;;  %v840_v46 = vsel %vm839_vm7, %v834_v43, %v836_v39 }
  0xb5   : > { %1135 = vmatpush1.msk.msra.mxu1 %vm192_vm2, %v360_v45  ;;  %1155 = vmatpush1.msk.msra.mxu0 %vm192_vm2, %v840_v46 }
  0xb6   : > { %1136 = vmatmul.mubr.msk.f32.vlgmr.msra.gmra.mrb[0].mxu1 %vm188_vm3, %v1133_v44 }
  0xb7   : > { %v452_v48 = vpop.permute.xlu0 %451  ;;  %v454_v49 = vpop.permute.xlu1 %453  ;;  %1156 = vmatmul.mubr.msk.f32.vlgmr.msra.gmra.mrb[0].mxu0 %vm188_vm3, %v1153_v47  ;;  %529 = vmatprep.mubr.f32.mxu1 %v1363_v3 }
  0xb8   : > { %v457_v50 = vsel %vm455_vm8, %v452_v48, %v454_v49  ;;  %1009 = vmatprep.mubr.f32.mxu0 %v1363_v3 }
  0xb9   : > { %1138 = vmatprep.subr.msk.mxu1 %vm192_vm2, %v457_v50 }
  0xbb   : > { %v932_v51 = vpop.permute.xlu0 %931  ;;  %v934_v52 = vpop.permute.xlu1 %933 }
  0xbc   : > { %v937_v53 = vsel %vm935_vm9, %v932_v51, %v934_v52 }
  0xbd   : > { %1158 = vmatprep.subr.msk.mxu0 %vm192_vm2, %v937_v53 }
  0xbf   : > { %v450_v54 = vpop.permute.xlu0 %449  ;;  %v930_v55 = vpop.permute.xlu1 %929 }
  0xc0   : > { %v456_v58 = vsel %vm455_vm8, %v450_v54, %v452_v48  ;;  %v936_v59 = vsel %vm935_vm9, %v930_v55, %v932_v51 }
  0xc1   : > { %1139 = vmatpush1.msk.msra.mxu1 %vm192_vm2, %v456_v58  ;;  %1159 = vmatpush1.msk.msra.mxu0 %vm192_vm2, %v936_v59 }
  0xc2   : > { %1140 = vmatmul.mubr.msk.f32.vlgmr.msra.gmra.mrb[0].mxu1 %vm188_vm3, %v1137_v56  ;;  %1160 = vmatmul.mubr.msk.f32.vlgmr.msra.gmra.mrb[0].mxu0 %vm188_vm3, %v1157_v57 }
 0x195   : > { %v531_v60 = vpop.f32.mrb[0].mxu1  ;;  %v1011_v61 = vpop.f32.mrb[0].mxu0 }
 0x196   : > { %v1167_v62 = vadd.f32 %v1011_v61, %v531_v60  ;;  %v533_v63 = vpop.f32.mrb[1].mxu1  ;;  %v1013_v0 = vpop.f32.mrb[1].mxu0 }
 0x197   : > { %v1168_v1 = vadd.f32 %v1013_v0, %v533_v63 }
 0x198   : > { %1018 = vst [vmem:[%s160_s21] sm:$0xff] %v1167_v62 }
 0x199   : > { %1019 = vst [vmem:[%s160_s21 + $0x8] sm:$0xff] %v1168_v1 }
 0x19a   : > { %1279 = shalt.err (!%p1276_p7)
}
 0x19b   : > { %s1280_s4 = scalar_lea.hbm %s1573_s28, 256  ;;  %s1284_s7 = scalar_lea.hbm %s1628_s2, 1024 }
 0x19c   : > { %p1281_p9 = scmp.ne.s32.totalorder %s1573_s28, %s1280_s4  ;;  %p1285_p12 = scmp.lt.u32.totalorder %s1573_s28, %s1628_s2 }
 0x19d   : > { %p1286_p13 = scmp.lt.u32.totalorder %s1284_s7, %s1280_s4  ;;  %p1288_p1 = scmp.lt.u32.totalorder %s1280_s4, %s1573_s28 }
 0x19e   : > { %p1282_p10 = pnand %p1281_p9, %p1438_p3 }
 0x19f   : > { %p1287_p0 = por %p1286_p13, %p1285_p12 }
 0x1a0   : > { %p1283_p11 = pneg %p1282_p10 }
 0x1a1   : > { %p1289_p2 = por %p1288_p1, %p1287_p0 }
 0x1a3   : > { %p1290_p4 = pnand %p1289_p2, %p1283_p11 }
 0x1a5   : > { %1293 = shalt.err (!%p1290_p4)
}
 0x1a6   : > { %1185 = dma.vmem_to_hbm [thread:$0]  (%p1438_p3), %s1575_s24, 256, %s1573_s28, %s1021_s12  }
 0x1a7 PF: > { %p1191_p5 = scmp.ge.s32.totalorder %s1360_s16, 2  ;;  %s1049_s18 = sand.u32 1, %s1332_s9  }
 0x1a8   : > { %s1050_s21 = scalar_lea.sflag [#allocation3], %s1049_s18 }
 0x1a9   : > { %p1188_p6 = pnand %p1191_p5, %p1447_p8 }
 0x1ab   : > { %1327 = dma.done.wait (!%p1188_p6), %s1050_s21, 256  }
 0x1ac   : > { %1329 = vsyncadd (!%p1188_p6), %s1050_s21, 4294967040  ;;  %s15_s16 = sadd.s32 1, %s1360_s16   ;;  %s1631_s9 = smov %s1336_s10 }
 0x1ad   : > { %p12_p7 = scmp.ge.s32.totalorder %s15_s16, 6   ;;  %s1632_s10 = smov %s1340_s11 }
 0x1ae   : > { %s1633_s11 = smov %s1456_s27  ;;  %s1634_s12 = smov %s1352_s14 }
 0x1af   : > { %s1635_s13 = smov %s1356_s15  ;;  %s1636_s14 = smov %s1639_s19 }
 0x1b0   : > { %s1637_s15 = smov %s1643_s20  ;;  %14 = sbr.rel (!%p12_p7) target bundleno = 5 (0x5), region = 71 }
 0x1b7   :  { %1055 = vsyncpa [#allocation3], 1 }
 0x1b8   :  { %1057 = vsyncpa [#allocation3 + $0x1], 1 }

</bundles_post_ra>
